<compile_context>
chip_gen: v7x
topology: tpu7x:2x2x1
jax: 0.10.0
libtpu: 0.0.40
codegen_flags: <defaults>
</compile_context>

<pallas_src>
import math

import jax
import jax.numpy as jnp
import numpy as np
from jax.experimental import pallas as pl
from jax.experimental.pallas import tpu as pltpu

LANE = 128
NEG = -1e30  # -inf stand-in for masked softmax lanes


def _round8(x):
    return ((x + 7) // 8) * 8


# ----------------------------------------------------------------------------
# Parameter slab layout: every piece starts on an 8-sublane boundary, lane=128.
#   w1 : (U,   128)  attn1 weight (in, out) zero-padded beyond da lanes
#   b1 : (8,   128)  row 0 = attn1 bias, zero-padded
#   w2 : (128, 128)  attn2 weight, rows>=da and lanes>=r are zero
#   b2 : (8,   128)  row 0 = attn2 bias, lanes>=r filled with -1e30 (softmax mask)
#   wm : (128, 128)  mlp2 weight, rows>=r and lanes>=C are zero
#   bm : (8,   128)  row 0 = mlp2 bias, lanes>=C filled with -1e30 (softmax mask)
# ----------------------------------------------------------------------------
def head_layout(U):
    off = {}
    off['w1'] = 0
    off['b1'] = _round8(U)
    off['w2'] = off['b1'] + 8
    off['b2'] = off['w2'] + LANE
    off['wm'] = off['b2'] + 8
    off['bm'] = off['wm'] + LANE
    total = off['bm'] + 8
    return off, total


def build_head_slab(p, U, da, r, C):
    off, total = head_layout(U)
    slab = jnp.zeros((total, LANE), jnp.float32)
    slab = slab.at[off['w1']:off['w1'] + U, :da].set(p['w1t'].astype(jnp.float32))
    slab = slab.at[off['b1'], :da].set(p['b1'].astype(jnp.float32))
    slab = slab.at[off['w2']:off['w2'] + da, :r].set(p['w2t'].astype(jnp.float32))
    b2_row = jnp.full((LANE,), NEG, jnp.float32).at[:r].set(p['b2'].astype(jnp.float32))
    slab = slab.at[off['b2'], :].set(b2_row)
    slab = slab.at[off['wm']:off['wm'] + r, :C].set(p['wm2t'].astype(jnp.float32))
    bm_row = jnp.full((LANE,), NEG, jnp.float32).at[:C].set(p['bm2'].astype(jnp.float32))
    slab = slab.at[off['bm'], :].set(bm_row)
    return slab, off


# ----------------------------------------------------------------------------
# Pallas kernel: attention head on a row-tile of flattened H.
#   h_ref : (TN, U)        LSTM outputs (rows = batch*slen tile)
#   p_ref : (ROWS, 128)    packed parameter slab (single DMA)
#   o_ref : (TN, 128)      lane-dense softmax output (cols >= C are exactly 0)
# ----------------------------------------------------------------------------
def make_head_kernel(U, off):
    w1_lo, b1_lo = off['w1'], off['b1']
    w2_lo, b2_lo = off['w2'], off['b2']
    wm_lo, bm_lo = off['wm'], off['bm']

    def kernel(h_ref, p_ref, o_ref):
        Hf = h_ref[...]                                   # (TN, U) f32

        W1 = p_ref[w1_lo:w1_lo + U, :]                    # (U, 128)
        b1 = p_ref[b1_lo:b1_lo + 1, :]                    # (1, 128)
        W2 = p_ref[w2_lo:w2_lo + LANE, :]                 # (128, 128)
        b2 = p_ref[b2_lo:b2_lo + 1, :]                    # (1, 128) (-1e30 masked)
        Wm = p_ref[wm_lo:wm_lo + LANE, :]                 # (128, 128)
        bm = p_ref[bm_lo:bm_lo + 1, :]                    # (1, 128) (-1e30 masked)

        # Attn1 = tanh(H @ W1^T + b1) : lanes >= da stay exactly 0.
        a1 = jnp.tanh(jnp.dot(Hf, W1, preferred_element_type=jnp.float32) + b1)

        # Attn2 = Attn1 @ W2^T + b2 : lanes >= r are -1e30 (softmax mask).
        a2 = jnp.dot(a1, W2, preferred_element_type=jnp.float32) + b2

        # A = softmax over r (128-lane softmax == r-lane softmax thanks to -1e30 pad)
        a2 = a2 - jnp.max(a2, axis=-1, keepdims=True)
        ea = jnp.exp(a2)
        A = ea / jnp.sum(ea, axis=-1, keepdims=True)      # exact division (tolerance)

        # mlp2(A) : lanes >= C are -1e30 (softmax mask).
        m2 = jnp.dot(A, Wm, preferred_element_type=jnp.float32) + bm

        # out = softmax over tagset; padded lanes come out exactly 0 -> unmasked store.
        m2 = m2 - jnp.max(m2, axis=-1, keepdims=True)
        e2 = jnp.exp(m2)
        o_ref[...] = e2 / jnp.sum(e2, axis=-1, keepdims=True)

    return kernel


def head_pallas(Hf, slab, off, U, C):
    N = Hf.shape[0]
    # Row tile: whole array for small N; 256-row tiles otherwise so the batch grid
    # can shard across v7x's two TensorCores via "parallel" semantics.
    TN = 256 if (N > 256 and N % 256 == 0) else N
    grid = (N // TN,)
    out = pl.pallas_call(
        make_head_kernel(U, off),
        out_shape=jax.ShapeDtypeStruct((N, LANE), jnp.float32),
        grid_spec=pltpu.PrefetchScalarGridSpec(
            num_scalar_prefetch=0,
            grid=grid,
            in_specs=[
                pl.BlockSpec((TN, U), lambda i: (i, 0)),
                pl.BlockSpec((slab.shape[0], LANE), lambda i: (0, 0)),
            ],
            out_specs=pl.BlockSpec((TN, LANE), lambda i: (i, 0)),
        ),
        compiler_params=pltpu.CompilerParams(
            dimension_semantics=("parallel",)),
    )(Hf, slab)
    return out[:, :C]


# ----------------------------------------------------------------------------
# Plain-JAX glue: embedding lookup + bidirectional LSTM (PyTorch gate order i,f,g,o).
# Input projection is hoisted out of the scan; both directions run in ONE scan.
# TODO(synk): the nn.LSTM time recurrence is inherently sequential and stays in
#             plain JAX (lax.scan) rather than being expressed as a Pallas kernel.
# ----------------------------------------------------------------------------
def bilstm(embeds, p_fwd, p_bwd):
    B, S, E = embeds.shape
    Uh = p_fwd['w_hh'].shape[1]

    w_ih = jnp.stack([p_fwd['w_ih'], p_bwd['w_ih']])            # (2, 4U, E)
    w_hh = jnp.stack([p_fwd['w_hh'], p_bwd['w_hh']])            # (2, 4U, U)
    b = jnp.stack([p_fwd['b_ih'] + p_fwd['b_hh'],
                   p_bwd['b_ih'] + p_bwd['b_hh']])              # (2, 4U)

    # Hoisted input projection for all timesteps and both directions.
    gx = jnp.einsum('bse,dge->dsbg', embeds, w_ih) + b[:, None, None, :]   # (2,S,B,4U)
    gx = gx.at[1].set(gx[1, ::-1])          # backward direction consumes reversed time

    def step(carry, gx_t):                  # gx_t: (2, B, 4U)
        h, c = carry                        # (2, B, U) each
        gates = gx_t + jnp.einsum('dbu,dgu->dbg', h, w_hh)
        i, f, g, o = jnp.split(gates, 4, axis=-1)
        c = jax.nn.sigmoid(f) * c + jax.nn.sigmoid(i) * jnp.tanh(g)
        h = jax.nn.sigmoid(o) * jnp.tanh(c)
        return (h, c), h

    init = (jnp.zeros((2, B, Uh), embeds.dtype),
            jnp.zeros((2, B, Uh), embeds.dtype))
    _, hs = jax.lax.scan(step, init, jnp.swapaxes(gx, 0, 1))    # (S, 2, B, U)

    h_f = hs[:, 0]                                              # (S, B, U)
    h_b = hs[::-1, 1]                                           # un-reverse time
    H = jnp.concatenate([h_f, h_b], axis=-1)                    # (S, B, 2U)
    return jnp.swapaxes(H, 0, 1)                                # (B, S, 2U)


def compute_H(words_sb, params):
    words = words_sb.T                                          # (slen,batch)->(batch,slen)
    embeds = params['embed'][words]                             # (B, S, E) gather
    return bilstm(embeds, params['lstm_fwd'], params['lstm_bwd']).astype(jnp.float32)


def forward(words_sb, params, slab, off, U, C):
    H = compute_H(words_sb, params)                             # (B, S, U)
    B, S, _ = H.shape
    Hf = H.reshape(B * S, U)                                    # view(batch*slen, u)
    return head_pallas(Hf, slab, off, U, C)                     # (B*S, C)


# Pure-JAX reference of the head (same LSTM glue) for a correctness check.
def forward_ref(words_sb, params, U, C):
    H = compute_H(words_sb, params)
    B, S, _ = H.shape
    Hf = H.reshape(B * S, U)
    a1 = jnp.tanh(Hf @ params['w1t'] + params['b1'])
    a2 = a1 @ params['w2t'] + params['b2']
    A = jax.nn.softmax(a2, axis=-1)
    m2 = A @ params['wm2t'] + params['bm2']
    return jax.nn.softmax(m2, axis=-1)


# ----------------------------------------------------------------------------
# Deterministic parameter init (shapes dictated by the non-CUDA __init__ branch:
# attn1/attn2/mlp2 all carry biases).
# ----------------------------------------------------------------------------
def init_params(key, vocab, e, lstm_dim, da, r, c, u):
    ks = jax.random.split(key, 16)

    def unif(k, shape, bound):
        return jax.random.uniform(k, shape, jnp.float32, -bound, bound)

    kl = 1.0 / math.sqrt(lstm_dim)
    ka = 1.0 / math.sqrt(u)
    kb = 1.0 / math.sqrt(da)
    kc = 1.0 / math.sqrt(r)

    return {
        'embed': jax.random.normal(ks[0], (vocab, e), jnp.float32),
        'lstm_fwd': dict(w_ih=unif(ks[1], (4 * lstm_dim, e), kl),
                         w_hh=unif(ks[2], (4 * lstm_dim, lstm_dim), kl),
                         b_ih=unif(ks[3], (4 * lstm_dim,), kl),
                         b_hh=unif(ks[4], (4 * lstm_dim,), kl)),
        'lstm_bwd': dict(w_ih=unif(ks[5], (4 * lstm_dim, e), kl),
                         w_hh=unif(ks[6], (4 * lstm_dim, lstm_dim), kl),
                         b_ih=unif(ks[7], (4 * lstm_dim,), kl),
                         b_hh=unif(ks[8], (4 * lstm_dim,), kl)),
        # attn1: Linear(u, da)   (weights stored pre-transposed: (in, out))
        'w1t': unif(ks[9], (u, da), ka),
        'b1':  unif(ks[10], (da,), ka),
        # attn2: Linear(da, r)
        'w2t': unif(ks[11], (da, r), kb),
        'b2':  unif(ks[12], (r,), kb),
        # mlp2: Linear(r, c)
        'wm2t': unif(ks[13], (r, c), kc),
        'bm2':  unif(ks[14], (c,), kc),
    }


if __name__ == "__main__":
    vocab, e, lstm_dim, bilstm_flag = 50, 16, 16, True
    da, r, c = 16, 8, 5
    batch, slen = 2, 8
    u = lstm_dim * 2 if bilstm_flag else lstm_dim

    key = jax.random.PRNGKey(0)
    pkey, wkey = jax.random.split(key)
    params = init_params(pkey, vocab, e, lstm_dim, da, r, c, u)
    slab, off = build_head_slab(params, u, da, r, c)

    # words arrive as (slen, batch), as implied by words.data.t_() in forward().
    words = jax.random.randint(wkey, (slen, batch), 0, vocab, dtype=jnp.int32)

    fwd = jax.jit(lambda w: forward(w, params, slab, off, u, c))
    ref = jax.jit(lambda w: forward_ref(w, params, u, c))

    out = jax.block_until_ready(fwd(words))
    expected = jax.block_until_ready(ref(words))

    assert out.shape == (batch * slen, c), out.shape
    np.testing.assert_allclose(np.asarray(out), np.asarray(expected),
                               rtol=1e-5, atol=1e-5)
    np.testing.assert_allclose(np.asarray(out).sum(axis=-1),
                               np.ones(batch * slen), rtol=1e-5, atol=1e-5)
    print("KERNEL_OK")
</pallas_src>

<mosaic_0001>
module attributes {stable_mosaic.version = 11 : i64} {
  func.func @kernel(%arg0: i32, %arg1: memref<16x32xf32, #tpu.memory_space<vmem>>, %arg2: memref<312x128xf32, #tpu.memory_space<vmem>>, %arg3: memref<16x128xf32, #tpu.memory_space<vmem>>) attributes {dimension_semantics = [#tpu.dimension_semantics<parallel>], iteration_bounds = array<i64: 1>, scalar_prefetch = 0 : i64, scratch_operands = 0 : i64, tpu.core_type = #tpu.core_type<tc>, window_params = [{transform_indices = @transform_0, window_bounds = array<i64: 16, 32>}, {pipeline_mode = #tpu.pipeline_mode<synchronous>, transform_indices = @transform_1, window_bounds = array<i64: 312, 128>}, {transform_indices = @transform_2, window_bounds = array<i64: 16, 128>}]} {
    %c0 = arith.constant 0 : index
    %c0_0 = arith.constant 0 : index
    %0 = vector.load %arg1[%c0, %c0_0] : memref<16x32xf32, #tpu.memory_space<vmem>>, vector<16x32xf32>
    %c0_1 = arith.constant 0 : index
    %c0_2 = arith.constant 0 : index
    %1 = vector.load %arg2[%c0_1, %c0_2] : memref<312x128xf32, #tpu.memory_space<vmem>>, vector<32x128xf32>
    %c32 = arith.constant 32 : index
    %c0_3 = arith.constant 0 : index
    %2 = vector.load %arg2[%c32, %c0_3] : memref<312x128xf32, #tpu.memory_space<vmem>>, vector<1x128xf32>
    %c40 = arith.constant 40 : index
    %c0_4 = arith.constant 0 : index
    %3 = vector.load %arg2[%c40, %c0_4] : memref<312x128xf32, #tpu.memory_space<vmem>>, vector<128x128xf32>
    %c168 = arith.constant 168 : index
    %c0_5 = arith.constant 0 : index
    %4 = vector.load %arg2[%c168, %c0_5] : memref<312x128xf32, #tpu.memory_space<vmem>>, vector<1x128xf32>
    %c176 = arith.constant 176 : index
    %c0_6 = arith.constant 0 : index
    %5 = vector.load %arg2[%c176, %c0_6] : memref<312x128xf32, #tpu.memory_space<vmem>>, vector<128x128xf32>
    %c304 = arith.constant 304 : index
    %c0_7 = arith.constant 0 : index
    %6 = vector.load %arg2[%c304, %c0_7] : memref<312x128xf32, #tpu.memory_space<vmem>>, vector<1x128xf32>
    %cst = arith.constant dense<0.000000e+00> : vector<16x128xf32>
    %7 = tpu.matmul %0, %1, %cst {dimension_numbers = #tpu.dot_dimension_numbers<[1], [0], [0], [1], [0, 0, 1, 1], [], []>} : vector<16x32xf32>, vector<32x128xf32>, vector<16x128xf32> -> vector<16x128xf32>
    %8 = vector.broadcast %2 : vector<1x128xf32> to vector<16x128xf32>
    %9 = arith.addf %7, %8 : vector<16x128xf32>
    %10 = math.tanh %9 : vector<16x128xf32>
    %cst_8 = arith.constant dense<0.000000e+00> : vector<16x128xf32>
    %11 = tpu.matmul %10, %3, %cst_8 {dimension_numbers = #tpu.dot_dimension_numbers<[1], [0], [0], [1], [0, 0, 1, 1], [], []>} : vector<16x128xf32>, vector<128x128xf32>, vector<16x128xf32> -> vector<16x128xf32>
    %12 = vector.broadcast %4 : vector<1x128xf32> to vector<16x128xf32>
    %13 = arith.addf %11, %12 : vector<16x128xf32>
    %cst_9 = arith.constant dense<0xFF800000> : vector<16xf32>
    %14 = vector.multi_reduction <maximumf>, %13, %cst_9 [1] : vector<16x128xf32> to vector<16xf32>
    %15 = vector.shape_cast %14 : vector<16xf32> to vector<16x1xf32>
    %16 = vector.broadcast %15 : vector<16x1xf32> to vector<16x128xf32>
    %17 = arith.subf %13, %16 : vector<16x128xf32>
    %18 = math.exp %17 : vector<16x128xf32>
    %cst_10 = arith.constant dense<0.000000e+00> : vector<16xf32>
    %19 = vector.multi_reduction <add>, %18, %cst_10 [1] : vector<16x128xf32> to vector<16xf32>
    %20 = vector.shape_cast %19 : vector<16xf32> to vector<16x1xf32>
    %21 = vector.broadcast %20 : vector<16x1xf32> to vector<16x128xf32>
    %22 = arith.divf %18, %21 : vector<16x128xf32>
    %cst_11 = arith.constant dense<0.000000e+00> : vector<16x128xf32>
    %23 = tpu.matmul %22, %5, %cst_11 {dimension_numbers = #tpu.dot_dimension_numbers<[1], [0], [0], [1], [0, 0, 1, 1], [], []>} : vector<16x128xf32>, vector<128x128xf32>, vector<16x128xf32> -> vector<16x128xf32>
    %24 = vector.broadcast %6 : vector<1x128xf32> to vector<16x128xf32>
    %25 = arith.addf %23, %24 : vector<16x128xf32>
    %cst_12 = arith.constant dense<0xFF800000> : vector<16xf32>
    %26 = vector.multi_reduction <maximumf>, %25, %cst_12 [1] : vector<16x128xf32> to vector<16xf32>
    %27 = vector.shape_cast %26 : vector<16xf32> to vector<16x1xf32>
    %28 = vector.broadcast %27 : vector<16x1xf32> to vector<16x128xf32>
    %29 = arith.subf %25, %28 : vector<16x128xf32>
    %30 = math.exp %29 : vector<16x128xf32>
    %cst_13 = arith.constant dense<0.000000e+00> : vector<16xf32>
    %31 = vector.multi_reduction <add>, %30, %cst_13 [1] : vector<16x128xf32> to vector<16xf32>
    %32 = vector.shape_cast %31 : vector<16xf32> to vector<16x1xf32>
    %33 = vector.broadcast %32 : vector<16x1xf32> to vector<16x128xf32>
    %34 = arith.divf %30, %33 : vector<16x128xf32>
    %c0_14 = arith.constant 0 : index
    %c0_15 = arith.constant 0 : index
    %35 = vector.load %arg3[%c0_14, %c0_15] : memref<16x128xf32, #tpu.memory_space<vmem>>, vector<16x128xf32>
    tpu.vector_store %arg3[%c0_14, %c0_15], %34 {strides = array<i32>} : memref<16x128xf32, #tpu.memory_space<vmem>>, vector<16x128xf32>,
    return
  }
  func.func @transform_0(%arg0: i32) -> (i32, i32) {
    %c0_i32 = arith.constant 0 : i32
    %c0_i32_0 = arith.constant 0 : i32
    return %arg0, %c0_i32 : i32, i32
  }
  func.func @transform_1(%arg0: i32) -> (i32, i32) {
    %c0_i32 = arith.constant 0 : i32
    %c0_i32_0 = arith.constant 0 : i32
    %c0_i32_1 = arith.constant 0 : i32
    return %c0_i32, %c0_i32_0 : i32, i32
  }
  func.func @transform_2(%arg0: i32) -> (i32, i32) {
    %c0_i32 = arith.constant 0 : i32
    %c0_i32_0 = arith.constant 0 : i32
    return %arg0, %c0_i32 : i32, i32
  }
}

</mosaic_0001>

<bundles_post_ra>
// kernel: custom-call.4
= control target key start
LH: loop header
LB: loop body
LE: loop exit
PB: predicated region body
PF: predicated region fallthrough
CT: control target
= control target key end

     0   :  { %s6_s0 = inlined_call_operand.vmem [shape: f32[8,2,2,16], index: 0, kind: output, shape index: {}]  }

// kernel: custom-call.1
= control target key start
LH: loop header
LB: loop body
LE: loop exit
PB: predicated region body
PF: predicated region fallthrough
CT: control target
= control target key end

     0   :  { %s6_s0 = inlined_call_operand.vmem [shape: f32[2,2,16], index: 0, kind: output, shape index: {}]  }

// kernel: custom-call
= control target key start
LH: loop header
LB: loop body
LE: loop exit
PB: predicated region body
PF: predicated region fallthrough
CT: control target
= control target key end

     0   :  { %s6_s0 = inlined_call_operand.vmem [shape: bf16[2,2,16], index: 0, kind: output, shape index: {}]  }

// kernel: _lambda_.1
= control target key start
LH: loop header
LB: loop body
LE: loop exit
PB: predicated region body
PF: predicated region fallthrough
CT: control target
= control target key end

     0   :  { %vm56_vm0 = vcmask 261120   ;;  %s706_s1 = inlined_call_operand.vmem [shape: f32[312,128], index: 1, kind: input, shape index: {}]   ;;  %s707_s0 = inlined_call_operand.vmem [shape: f32[16,32], index: 0, kind: input, shape index: {}]   ;;  %s708_s2 = inlined_call_operand.vmem [shape: f32[16,128], index: 2, kind: output, shape index: {}]  }
   0x1   :  { %v13_v0 = vld [vmem:[%s706_s1] sm:$0xff]  ;;  %v14_v1 = vld [vmem:[%s706_s1 + $0x8] sm:$0xff]  ;;  %v15_v2 = vld [vmem:[%s706_s1 + $0x10] sm:$0xff] }
   0x2   :  { %v468_v3 = vpack.c.bf16 %v14_v1, %v13_v0  ;;  %v16_v4 = vld [vmem:[%s706_s1 + $0x18] sm:$0xff]  ;;  %v11_v5 = vld [vmem:[%s707_s0] sm:$0xff]  ;;  %v18_v7 = vld [vmem:[%s706_s1 + $0x28] sm:$0xff] }
   0x3   :  { %v472_v6 = vpack.c.bf16 %v16_v4, %v15_v2  ;;  %395 = vmatprep.mubr.msk.f32.mxu0 %vm56_vm0, %v11_v5  ;;  %v19_v8 = vld [vmem:[%s706_s1 + $0x30] sm:$0xff]  ;;  %v20_v9 = vld [vmem:[%s706_s1 + $0x38] sm:$0xff]  ;;  %v21_v11 = vld [vmem:[%s706_s1 + $0x40] sm:$0xff] }
   0x4   :  { %469 = vmatprep.subr.bf16.mxu0 %v468_v3  ;;  %v476_v10 = vpack.c.bf16 %v19_v8, %v18_v7  ;;  %v480_v12 = vpack.c.bf16 %v21_v11, %v20_v9  ;;  %v22_v13 = vld [vmem:[%s706_s1 + $0x48] sm:$0xff]  ;;  %v23_v14 = vld [vmem:[%s706_s1 + $0x50] sm:$0xff]  ;;  %v24_v17 = vld [vmem:[%s706_s1 + $0x58] sm:$0xff] }
   0x5   :  { %471 = vmatpush3.bf16.msra.mxu0 %v468_v3  ;;  %v484_v15 = vpack.c.bf16 %v23_v14, %v22_v13  ;;  %v12_v16 = vld [vmem:[%s707_s0 + $0x8] sm:$0xff]  ;;  %v25_v18 = vld [vmem:[%s706_s1 + $0x60] sm:$0xff]  ;;  %v27_v21 = vld [vmem:[%s706_s1 + $0x70] sm:$0xff] }
   0x6   :  { %473 = vmatprep.subr.bf16.mxu0 %v472_v6  ;;  %477 = vmatprep.subr.bf16.mxu1 %v476_v10  ;;  %v488_v19 = vpack.c.bf16 %v25_v18, %v24_v17  ;;  %v26_v20 = vld [vmem:[%s706_s1 + $0x68] sm:$0xff]  ;;  %v28_v23 = vld [vmem:[%s706_s1 + $0x78] sm:$0xff]  ;;  %v29_v24 = vld [vmem:[%s706_s1 + $0x80] sm:$0xff] }
   0x7   :  { %479 = vmatpush3.bf16.msra.mxu1 %v476_v10  ;;  %v492_v22 = vpack.c.bf16 %v27_v21, %v26_v20  ;;  %v496_v25 = vpack.c.bf16 %v29_v24, %v28_v23  ;;  %v30_v26 = vld [vmem:[%s706_s1 + $0x88] sm:$0xff]  ;;  %v31_v27 = vld [vmem:[%s706_s1 + $0x90] sm:$0xff]  ;;  %v32_v28 = vld [vmem:[%s706_s1 + $0x98] sm:$0xff] }
   0x8   :  { %481 = vmatprep.subr.bf16.mxu1 %v480_v12  ;;  %v500_v29 = vpack.c.bf16 %v31_v27, %v30_v26  ;;  %v33_v30 = vld [vmem:[%s706_s1 + $0xa0] sm:$0xff]  ;;  %v343_v39 = vld [vmem:[%s706_s1 + $0xa8] ss:$0 sm:$0xff]  ;;  %v35_v44 = vld [vmem:[%s706_s1 + $0xb0] sm:$0xff] }
   0x9   :  { %475 = vmatpush3.bf16.msra.mxu0 %v472_v6  ;;  %v504_v31 = vpack.c.bf16 %v33_v30, %v32_v28  ;;  %v340_v32 = vld [vmem:[%s706_s1 + $0x20] ss:$0 sm:$0xff]  ;;  %v36_v45 = vld [vmem:[%s706_s1 + $0xb8] sm:$0xff]  ;;  %v38_v48 = vld [vmem:[%s706_s1 + $0xc8] sm:$0xff] }
   0xa   :  { %v37_v46 = vld [vmem:[%s706_s1 + $0xc0] sm:$0xff]  ;;  %v508_v47 = vpack.c.bf16 %v36_v45, %v35_v44  ;;  %v39_v50 = vld [vmem:[%s706_s1 + $0xd0] sm:$0xff]  ;;  %v40_v51 = vld [vmem:[%s706_s1 + $0xd8] sm:$0xff] }
   0xb   :  { %483 = vmatpush3.bf16.msra.mxu1 %v480_v12  ;;  %v512_v49 = vpack.c.bf16 %v38_v48, %v37_v46  ;;  %v516_v52 = vpack.c.bf16 %v40_v51, %v39_v50  ;;  %v41_v53 = vld [vmem:[%s706_s1 + $0xe0] sm:$0xff]  ;;  %v42_v54 = vld [vmem:[%s706_s1 + $0xe8] sm:$0xff]  ;;  %v43_v0 = vld [vmem:[%s706_s1 + $0xf0] sm:$0xff] }
   0xc   :  { %396 = vmatmul.mubr.msk.f32.vlgmr.msra.gmra.mrb[0].mxu0 %vm56_vm0, %v12_v16  ;;  %485 = vmatprep.subr.bf16.mxu1 %v484_v15  ;;  %v520_v55 = vpack.c.bf16 %v42_v54, %v41_v53  ;;  %v44_v1 = vld [vmem:[%s706_s1 + $0xf8] sm:$0xff]  ;;  %v45_v3 = vld [vmem:[%s706_s1 + $0x100] sm:$0xff]  ;;  %v46_v4 = vld [vmem:[%s706_s1 + $0x108] sm:$0xff] }
   0xd   :  { %509 = vmatprep.subr.bf16.mxu0 %v508_v47  ;;  %v524_v2 = vpack.c.bf16 %v44_v1, %v43_v0  ;;  %v528_v5 = vpack.c.bf16 %v46_v4, %v45_v3  ;;  %v47_v6 = vld [vmem:[%s706_s1 + $0x110] sm:$0xff]  ;;  %v48_v7 = vld [vmem:[%s706_s1 + $0x118] sm:$0xff]  ;;  %v49_v8 = vld [vmem:[%s706_s1 + $0x120] sm:$0xff] }
   0xe   :  { %511 = vmatpush3.bf16.msra.mxu0 %v508_v47  ;;  %v532_v9 = vpack.c.bf16 %v48_v7, %v47_v6  ;;  %v50_v10 = vld [vmem:[%s706_s1 + $0x128] sm:$0xff]  ;;  %v344_v18 = vld [vmem:[%s706_s1 + $0x130] ss:$0 sm:$0xff] }
   0xf   :  { %487 = vmatpush3.bf16.msra.mxu1 %v484_v15  ;;  %513 = vmatprep.subr.bf16.mxu0 %v512_v49  ;;  %v536_v11 = vpack.c.bf16 %v50_v10, %v49_v8 }
  0x10   :  { %489 = vmatprep.subr.bf16.mxu1 %v488_v19 }
  0x12   :  { %515 = vmatpush3.bf16.msra.mxu0 %v512_v49 }
  0x13   :  { %491 = vmatpush3.bf16.msra.mxu1 %v488_v19  ;;  %517 = vmatprep.subr.bf16.mxu0 %v516_v52 }
  0x14   :  { %493 = vmatprep.subr.bf16.mxu1 %v492_v22 }
  0x16   :  { %519 = vmatpush3.bf16.msra.mxu0 %v516_v52 }
  0x17   :  { %495 = vmatpush3.bf16.msra.mxu1 %v492_v22  ;;  %521 = vmatprep.subr.bf16.mxu0 %v520_v55 }
  0x18   :  { %497 = vmatprep.subr.bf16.mxu1 %v496_v25 }
  0x1a   :  { %523 = vmatpush3.bf16.msra.mxu0 %v520_v55 }
  0x1b   :  { %499 = vmatpush3.bf16.msra.mxu1 %v496_v25  ;;  %525 = vmatprep.subr.bf16.mxu0 %v524_v2 }
  0x1c   :  { %501 = vmatprep.subr.bf16.mxu1 %v500_v29 }
  0x1e   :  { %527 = vmatpush3.bf16.msra.mxu0 %v524_v2 }
  0x1f   :  { %503 = vmatpush3.bf16.msra.mxu1 %v500_v29  ;;  %529 = vmatprep.subr.bf16.mxu0 %v528_v5 }
  0x20   :  { %505 = vmatprep.subr.bf16.mxu1 %v504_v31 }
  0x22   :  { %531 = vmatpush3.bf16.msra.mxu0 %v528_v5 }
  0x23   :  { %507 = vmatpush3.bf16.msra.mxu1 %v504_v31  ;;  %533 = vmatprep.subr.bf16.mxu0 %v532_v9 }
  0x26   :  { %535 = vmatpush3.bf16.msra.mxu0 %v532_v9 }
  0x27   :  { %537 = vmatprep.subr.bf16.mxu0 %v536_v11 }
  0x2a   :  { %539 = vmatpush3.bf16.msra.mxu0 %v536_v11 }
  0xdf   :  { %v397_v33 = vpop.f32.mrb[0].mxu0 }
  0xe0   :  { %v135_v34 = vadd.f32 %v397_v33, %v340_v32  ;;  %v129_v35 = vpop.f32.mrb[1].mxu0 }
  0xe1   :  { %v130_v36 = vadd.f32 %v340_v32, %v129_v35 }
  0xe3   :  { %540 = vtanh.f32 %v130_v36 }
  0xe4   :  { %542 = vtanh.f32 %v135_v34 }
  0xed   :  { %v541_v37 = vpop.eup %540 }
  0xee   :  { %v543_v38 = vpop.eup %542  ;;  %430 = vmatprep.mubr.f32.mxu1 %v541_v37 }
  0xef   :  { %431 = vmatmul.mubr.f32.vlgmr.msra.gmra.mrb[0].mxu1 %v543_v38 }
 0x1c2   :  { %v432_v40 = vpop.f32.mrb[0].mxu1 }
 0x1c3   :  { %v210_v41 = vpop.f32.mrb[1].mxu1  ;;  %v216_v43 = vadd.f32 %v432_v40, %v343_v39 }
 0x1c4   :  { %v211_v42 = vadd.f32 %v343_v39, %v210_v41 }
 0x1c6   :  { %219 = vmax.xlane.f32.xlu0 %v211_v42 }
 0x1ca   :  { %221 = vmax.xlane.f32.xlu0 %v216_v43 }
 0x253   :  { %v220_v56 = vpop.xlane.xlu0 %219 }
 0x254   :  { %v223_v57 = vsub.f32 %v211_v42, %v220_v56 }
 0x256   :  { %v225_v58 = vmul.f32 1.442695, %v223_v57 }
 0x257   :  { %v222_v59 = vpop.xlane.xlu0 %221 }
 0x258   :  { %544 = vpow2.f32 %v225_v58  ;;  %v224_v60 = vsub.f32 %v216_v43, %v222_v59 }
 0x25a   :  { %v227_v61 = vmul.f32 1.442695, %v224_v60 }
 0x25c   :  { %546 = vpow2.f32 %v227_v61 }
 0x262   :  { %v545_v62 = vpop.eup %544 }
 0x263   :  { %229 = vadd.xlane.f32.xlu1 %v545_v62 }
 0x266   :  { %v547_v63 = vpop.eup %546 }
 0x267   :  { %231 = vadd.xlane.f32.xlu1 %v547_v63 }
 0x2f0   :  { %v230_v12 = vpop.xlane.xlu1 %229 }
 0x2f1   :  { %548 = vrcp.f32 %v230_v12 }
 0x2f4   :  { %v232_v13 = vpop.xlane.xlu1 %231 }
 0x2f5   :  { %550 = vrcp.f32 %v232_v13 }
 0x2fb   :  { %v549_v14 = vpop.eup %548 }
 0x2fc   :  { %v234_v15 = vmul.f32 %v549_v14, %v545_v62 }
 0x2fe   :  { %465 = vmatprep.mubr.f32.mxu0 %v234_v15 }
 0x2ff   :  { %v551_v16 = vpop.eup %550 }
 0x300   :  { %v236_v17 = vmul.f32 %v551_v16, %v547_v63 }
 0x302   :  { %466 = vmatmul.mubr.f32.vlgmr.msra.gmra.mrb[2].mxu0 %v236_v17 }
 0x3d5   :  { %v467_v19 = vpop.f32.mrb[2].mxu0 }
 0x3d6   :  { %v313_v20 = vadd.f32 %v467_v19, %v344_v18  ;;  %v307_v21 = vpop.f32.mrb[3].mxu0 }
 0x3d7   :  { %v308_v22 = vadd.f32 %v344_v18, %v307_v21 }
 0x3d8   :  { %318 = vmax.xlane.f32.xlu1 %v313_v20 }
 0x3d9   :  { %316 = vmax.xlane.f32.xlu0 %v308_v22 }
 0x465   :  { %v319_v23 = vpop.xlane.xlu1 %318 }
 0x466   :  { %v321_v24 = vsub.f32 %v313_v20, %v319_v23  ;;  %v317_v25 = vpop.xlane.xlu0 %316 }
 0x467   :  { %v320_v26 = vsub.f32 %v308_v22, %v317_v25 }
 0x468   :  { %v324_v27 = vmul.f32 1.442695, %v321_v24 }
 0x469   :  { %v322_v28 = vmul.f32 1.442695, %v320_v26 }
 0x46a   :  { %552 = vpow2.f32 %v324_v27 }
 0x46b   :  { %554 = vpow2.f32 %v322_v28 }
 0x474   :  { %v553_v29 = vpop.eup %552 }
 0x475   :  { %v555_v30 = vpop.eup %554  ;;  %328 = vadd.xlane.f32.xlu1 %v553_v29 }
 0x476   :  { %326 = vadd.xlane.f32.xlu0 %v555_v30 }
 0x502   :  { %v329_v31 = vpop.xlane.xlu1 %328 }
 0x503   :  { %556 = vrcp.f32 %v329_v31  ;;  %v327_v32 = vpop.xlane.xlu0 %326 }
 0x504   :  { %558 = vrcp.f32 %v327_v32 }
 0x50d   :  { %v557_v33 = vpop.eup %556 }
 0x50e   :  { %v559_v34 = vpop.eup %558  ;;  %v333_v35 = vmul.f32 %v557_v33, %v553_v29 }
 0x50f   :  { %v331_v36 = vmul.f32 %v559_v34, %v555_v30 }
 0x510   :  { %335 = vst [vmem:[%s708_s2 + $0x8] sm:$0xff] %v333_v35 }
 0x511   :  { %334 = vst [vmem:[%s708_s2] sm:$0xff] %v331_v36 }

</bundles_post_ra>
